<compile_context>
chip_gen: v5e
topology: v5e:2x2
jax: 0.10.0
libtpu: 0.0.40
codegen_flags: <defaults>
</compile_context>

<pallas_src>
import functools

import jax
import jax.numpy as jnp
from jax import lax
from jax.experimental import pallas as pl
from jax.experimental.pallas import tpu as pltpu

MIN = float(jnp.finfo(jnp.bfloat16).min)   # matches torch.finfo(torch.bfloat16).min
_KHI_MASKED = -32640                       # monotone-int16 key of bf16 MIN (bits 0xFF7F)
_KNOCKED = -(2 ** 31)                      # key sentinel for already-selected columns


def _token_selector_kernel(scores_ref, mask_ref, topk_mask_ref,
                           slab_ref, part_ref, *, k, rescale, offset):
    Bt, D = scores_ref.shape
    cw = 128                               # wrapper pads D to a multiple of 128
    nch = D // cw

    # ---- packed-key construction (one streaming pass over the block) -----------------
    # bf16 -> f32 widening is exact, so the bf16 bit pattern is the top 16 bits of the
    # f32 pattern.  khi is a monotone int encoding of the score value; low 16 key bits
    # encode (65535 - column) so larger key == larger value, ties broken by smaller index.
    sf = scores_ref[...].astype(jnp.float32)
    s16 = pltpu.bitcast(sf, jnp.int32) >> 16                    # arithmetic shift
    khi = jnp.where(s16 >= 0, s16, -32769 - s16)                # monotone in score value
    khi = jnp.where(mask_ref[...] != 0, khi, _KHI_MASKED)       # masked tokens -> bf16 MIN
    lane = lax.broadcasted_iota(jnp.int32, (Bt, cw), 1)
    keys = [khi[:, c * cw:(c + 1) * cw] * 65536 + ((65535 - c * cw) - lane)
            for c in range(nch)]
    # sf / s16 / khi / lane are dead past this point; only `keys` (Bt*D int32, ~64 KiB by
    # construction in the wrapper) is carried across the k passes.

    # ---- top-k: one 128-wide XLU max-reduce per pass ----------------------------------
    # k is a static Python int -> fully unrolled (live set is small; switch to
    # lax.fori_loop only if a bundle dump ever shows spills again).
    k_ids = lax.broadcasted_iota(jnp.int32, (Bt, k), 1)
    tk_key = jnp.zeros((Bt, k), jnp.int32)
    for j in range(k):
        pre = keys[0]
        for c in range(1, nch):
            pre = jnp.maximum(pre, keys[c])                     # VPU pre-reduce
        win = jnp.max(pre, axis=-1, keepdims=True)              # [Bt,1]  XLU, 128-wide
        tk_key = jnp.where(k_ids == j, win, tk_key)
        keys = [jnp.where(kc == win, _KNOCKED, kc) for kc in keys]   # exact knockout

    # ---- decode winners (tiny [Bt,k] work) ---------------------------------------------
    low = jnp.bitwise_and(tk_key, 0xFFFF)
    col = 65535 - low                                           # selected column index
    khi_w = tk_key >> 16
    s16_w = jnp.where(khi_w >= 0, khi_w, -32769 - khi_w)        # self-inverse map
    raw = pltpu.bitcast(s16_w * 65536, jnp.float32)             # exact bf16 score as f32
    tv = raw / rescale if rescale != 1.0 else raw
    if offset:
        tv = tv + offset
    tv = jnp.where(khi_w == _KHI_MASKED, MIN, tv)               # masked winners report MIN

    importance = 0.5 * (jnp.tanh(0.5 * tv) + 1.0)               # sigmoid via EUP tanh
    valid = (tv > MIN) & (topk_mask_ref[...] > 0)
    loss_mask = valid.astype(jnp.float32)        # dropout == 0 -> keep-mask is all ones

    # Per-block (num, den) partials of the batch-mean; finished in the wrapper so the
    # batch grid axis stays fully parallel (megacore-shardable on v7x).
    num = jnp.sum(importance * loss_mask, keepdims=True)        # (1, 1)
    den = jnp.sum(loss_mask, keepdims=True)                     # (1, 1)
    plane = lax.broadcasted_iota(jnp.int32, (1, 128), 1)
    part = jnp.where(plane == 0, num, 0.0) + jnp.where(plane == 1, den, 0.0)
    part_ref[...] = part.reshape(1, 1, 128)

    # Single lane-dense writeback: [top_k | sigmoid(top_k) | index (exact f32) | valid | pad].
    pieces = [tv, importance, col.astype(jnp.float32), loss_mask]
    pad_w = slab_ref.shape[-1] - 4 * k
    if pad_w:
        pieces.append(jnp.zeros((Bt, pad_w), jnp.float32))
    slab_ref[...] = jnp.concatenate(pieces, axis=-1)


def _choose_tiling(B, D_pad):
    """Batch tile Bt and block count: per-block int32 key slab ~<=64 KiB (vreg-file sized,
    no spills across the unrolled top-k), and >= 2 (preferably even) blocks when B > 8 so
    v7x's second TensorCore gets work."""
    cap = (64 * 1024) // (4 * D_pad)
    cap = max(8, min(128, cap))
    cap -= cap % (32 if cap >= 32 else 8)        # layout-friendly rows (int8 (32,128) tiles)
    bt = min(cap, ((B + 7) // 8) * 8)
    nblk = -(-B // bt)
    if nblk == 1 and B > 8:                      # split so both v7x cores are used
        bt = max(8, (((B + 1) // 2) + 7) // 8 * 8)
        nblk = -(-B // bt)
    if nblk > 1 and nblk % 2:                    # prefer an even block count (megacore)
        bt2 = max(8, ((-(-B // (nblk + 1))) + 7) // 8 * 8)
        if (-(-B // bt2)) % 2 == 0:
            bt, nblk = bt2, -(-B // bt2)
    return bt, nblk


def token_selector(scores, input_mask, topk_mask, *,
                   rescale=1.0, offset=0.2, target_scale=0.7,
                   loss_pow=1.0, loss_weight=0.01):
    """Pallas TokenSelector forward (training branch, default config)."""
    assert rescale > 0, "packed-key top-k assumes a positive (order-preserving) rescale"
    B, D = scores.shape
    K = topk_mask.shape[-1]
    D_pad = ((D + 127) // 128) * 128
    assert D_pad <= 65536, "column index must fit in 16 key bits"
    Bt, nblk = _choose_tiling(B, D_pad)
    B_pad = Bt * nblk
    W = ((4 * K + 127) // 128) * 128             # lane-dense slab width

    # Narrow the big inputs: scores travel as bf16, mask as int8 (cuts HBM->VMEM bytes).
    scores_b = scores.astype(jnp.bfloat16)       # selector is bf16-centric (MIN = bf16 min)
    mask_i8 = input_mask.astype(jnp.int8)
    topk_f32 = topk_mask.astype(jnp.float32)
    if B_pad != B or D_pad != D:                 # padded rows/cols are masked out (0)
        scores_b = jnp.pad(scores_b, ((0, B_pad - B), (0, D_pad - D)))
        mask_i8 = jnp.pad(mask_i8, ((0, B_pad - B), (0, D_pad - D)))
        topk_f32 = jnp.pad(topk_f32, ((0, B_pad - B), (0, 0)))

    kernel = functools.partial(_token_selector_kernel, k=K,
                               rescale=float(rescale), offset=float(offset))

    slab, partials = pl.pallas_call(
        kernel,
        grid=(nblk,),
        in_specs=[pl.BlockSpec((Bt, D_pad), lambda i: (i, 0)),
                  pl.BlockSpec((Bt, D_pad), lambda i: (i, 0)),
                  pl.BlockSpec((Bt, K), lambda i: (i, 0))],
        out_specs=(pl.BlockSpec((Bt, W), lambda i: (i, 0)),
                   pl.BlockSpec((1, 1, 128), lambda i: (i, 0, 0))),
        out_shape=(jax.ShapeDtypeStruct((B_pad, W), jnp.float32),
                   jax.ShapeDtypeStruct((nblk, 1, 128), jnp.float32)),
        compiler_params=pltpu.CompilerParams(dimension_semantics=("parallel",)),
    )(scores_b, mask_i8, topk_f32)

    top_k = slab[:B, :K]
    importance = slab[:B, K:2 * K]
    selection = slab[:B, 2 * K:3 * K].astype(jnp.int32)   # indices are exact integers in f32
    valid = slab[:B, 3 * K:4 * K] > 0.5

    # Finish the 'batch-mean' loss from per-block partials (num/den summed separately,
    # so padded/empty blocks contribute (0, 0) harmlessly).
    num = jnp.sum(partials[:, 0, 0])
    den = jnp.sum(partials[:, 0, 1])
    mean = num / den
    diff = jnp.abs(mean - target_scale)
    if loss_pow != 1:
        diff = diff ** loss_pow
    loss = diff * loss_weight
    return selection, top_k, importance, valid, loss, mean


def _reference(scores, input_mask, topk_mask, *,
               rescale=1.0, offset=0.2, target_scale=0.7,
               loss_pow=1.0, loss_weight=0.01):
    """Pure-JAX reference for correctness checking."""
    s = scores.astype(jnp.float32)
    if rescale != 1:
        s = s / rescale
    if offset:
        s = s + offset
    s = jnp.where(input_mask, s, MIN)
    K = topk_mask.shape[-1]
    tv, ti = lax.top_k(s, K)
    imp = jax.nn.sigmoid(tv)
    valid = (tv > MIN) & (topk_mask > 0)
    lm = valid.astype(jnp.float32)
    mean = jnp.sum(imp * lm) / jnp.sum(lm)
    diff = jnp.abs(mean - target_scale)
    if loss_pow != 1:
        diff = diff ** loss_pow
    loss = diff * loss_weight
    return ti, tv, imp, valid, loss, mean


if __name__ == "__main__":
    B, D, K = 8, 256, 16

    key = jax.random.PRNGKey(0)
    k1, k2 = jax.random.split(key)
    scores = jax.random.normal(k1, (B, D), dtype=jnp.float32).astype(jnp.bfloat16)

    # input mask: random, but first K columns always valid so every row has >= K valid tokens
    input_mask = jax.random.uniform(k2, (B, D)) > 0.2
    input_mask = input_mask.at[:, :K].set(True)

    # topk mask: all valid except the last slot of row 0 (exercises the topk_mask > 0 path)
    topk_mask = jnp.ones((B, K), dtype=jnp.float32).at[0, K - 1].set(0.0)

    sel, tv, imp, valid, loss, mean = jax.block_until_ready(
        token_selector(scores, input_mask, topk_mask))

    ti_r, tv_r, imp_r, valid_r, loss_r, mean_r = _reference(scores, input_mask, topk_mask)

    # correctness checks against the pure-JAX reference
    assert jnp.allclose(tv, tv_r, atol=1e-5, rtol=1e-5), "top-k values mismatch"
    assert jnp.allclose(imp, imp_r, atol=1e-5, rtol=1e-5), "importance mismatch"
    assert jnp.array_equal(valid, valid_r), "valid mask mismatch"
    assert jnp.allclose(loss, loss_r, atol=1e-6), "loss mismatch"
    assert jnp.allclose(mean, mean_r, atol=1e-6), "mean metric mismatch"
    # selected indices must gather back the reported (post-offset, masked) top-k values
    s_ref = jnp.where(input_mask, scores.astype(jnp.float32) + 0.2, MIN)
    gathered = jnp.take_along_axis(s_ref, sel, axis=-1)
    assert jnp.allclose(gathered, tv, atol=1e-5), "selection indices inconsistent"

    print("KERNEL_OK")
</pallas_src>

<mosaic_0001>
module attributes {stable_mosaic.version = 11 : i64} {
  func.func @_token_selector_kernel(%arg0: i32, %arg1: memref<8x256xbf16, #tpu.memory_space<vmem>>, %arg2: memref<8x256xi8, #tpu.memory_space<vmem>>, %arg3: memref<8x16xf32, #tpu.memory_space<vmem>>, %arg4: memref<8x128xf32, #tpu.memory_space<vmem>>, %arg5: memref<1x1x128xf32, #tpu.memory_space<vmem>>) attributes {dimension_semantics = [#tpu.dimension_semantics<parallel>], iteration_bounds = array<i64: 1>, scalar_prefetch = 0 : i64, scratch_operands = 0 : i64, tpu.core_type = #tpu.core_type<tc>, window_params = [{transform_indices = @transform_0, window_bounds = array<i64: 8, 256>}, {transform_indices = @transform_1, window_bounds = array<i64: 8, 256>}, {transform_indices = @transform_2, window_bounds = array<i64: 8, 16>}, {transform_indices = @transform_3, window_bounds = array<i64: 8, 128>}, {transform_indices = @transform_4, window_bounds = array<i64: 1, 1, 128>}]} {
    %c0 = arith.constant 0 : index
    %c0_0 = arith.constant 0 : index
    %0 = vector.load %arg1[%c0, %c0_0] : memref<8x256xbf16, #tpu.memory_space<vmem>>, vector<8x256xbf16>
    %1 = arith.extf %0 : vector<8x256xbf16> to vector<8x256xf32>
    %2 = tpu.bitcast %1 : vector<8x256xf32> -> vector<8x256xi32>
    %c16_i32 = arith.constant 16 : i32
    %3 = vector.broadcast %c16_i32 : i32 to vector<8x256xi32>
    %4 = arith.shrsi %2, %3 : vector<8x256xi32>
    %c0_i32 = arith.constant 0 : i32
    %5 = vector.broadcast %c0_i32 : i32 to vector<8x256xi32>
    %6 = arith.cmpi sge, %4, %5 : vector<8x256xi32>
    %c-32769_i32 = arith.constant -32769 : i32
    %7 = vector.broadcast %c-32769_i32 : i32 to vector<8x256xi32>
    %8 = arith.subi %7, %4 : vector<8x256xi32>
    %9 = arith.select %6, %4, %8 : vector<8x256xi1>, vector<8x256xi32>
    %c0_1 = arith.constant 0 : index
    %c0_2 = arith.constant 0 : index
    %10 = vector.load %arg2[%c0_1, %c0_2] : memref<8x256xi8, #tpu.memory_space<vmem>>, vector<8x256xi8>
    %c0_i8 = arith.constant 0 : i8
    %11 = vector.broadcast %c0_i8 : i8 to vector<8x256xi8>
    %12 = arith.cmpi ne, %10, %11 : vector<8x256xi8>
    %c-32640_i32 = arith.constant -32640 : i32
    %13 = vector.broadcast %c-32640_i32 : i32 to vector<8x256xi32>
    %14 = arith.select %12, %9, %13 : vector<8x256xi1>, vector<8x256xi32>
    %15 = tpu.iota {dimensions = array<i32: 1>} : vector<8x128xi32>
    %16 = vector.extract_strided_slice %14 {offsets = [0, 0], sizes = [8, 128], strides = [1, 1]} : vector<8x256xi32> to vector<8x128xi32>
    %c65536_i32 = arith.constant 65536 : i32
    %17 = vector.broadcast %c65536_i32 : i32 to vector<8x128xi32>
    %18 = arith.muli %16, %17 : vector<8x128xi32>
    %c65535_i32 = arith.constant 65535 : i32
    %19 = vector.broadcast %c65535_i32 : i32 to vector<8x128xi32>
    %20 = arith.subi %19, %15 : vector<8x128xi32>
    %21 = arith.addi %18, %20 : vector<8x128xi32>
    %22 = vector.extract_strided_slice %14 {offsets = [0, 128], sizes = [8, 128], strides = [1, 1]} : vector<8x256xi32> to vector<8x128xi32>
    %c65536_i32_3 = arith.constant 65536 : i32
    %23 = vector.broadcast %c65536_i32_3 : i32 to vector<8x128xi32>
    %24 = arith.muli %22, %23 : vector<8x128xi32>
    %c65407_i32 = arith.constant 65407 : i32
    %25 = vector.broadcast %c65407_i32 : i32 to vector<8x128xi32>
    %26 = arith.subi %25, %15 : vector<8x128xi32>
    %27 = arith.addi %24, %26 : vector<8x128xi32>
    %28 = tpu.iota {dimensions = array<i32: 1>} : vector<8x16xi32>
    %c0_i32_4 = arith.constant 0 : i32
    %29 = vector.broadcast %c0_i32_4 : i32 to vector<8x16xi32>
    %30 = arith.maxsi %21, %27 : vector<8x128xi32>
    %cst = arith.constant dense<-2147483648> : vector<8xi32>
    %31 = vector.multi_reduction <maxsi>, %30, %cst [1] : vector<8x128xi32> to vector<8xi32>
    %32 = vector.shape_cast %31 : vector<8xi32> to vector<8x1xi32>
    %c0_i32_5 = arith.constant 0 : i32
    %33 = vector.broadcast %c0_i32_5 : i32 to vector<8x16xi32>
    %34 = arith.cmpi eq, %28, %33 : vector<8x16xi32>
    %35 = vector.shape_cast %32 : vector<8x1xi32> to vector<8x1xi32>
    %36 = vector.broadcast %35 : vector<8x1xi32> to vector<8x16xi32>
    %37 = arith.select %34, %36, %29 : vector<8x16xi1>, vector<8x16xi32>
    %38 = vector.broadcast %32 : vector<8x1xi32> to vector<8x128xi32>
    %39 = arith.cmpi eq, %21, %38 : vector<8x128xi32>
    %c-2147483648_i32 = arith.constant -2147483648 : i32
    %40 = vector.broadcast %c-2147483648_i32 : i32 to vector<8x128xi32>
    %41 = arith.select %39, %40, %21 : vector<8x128xi1>, vector<8x128xi32>
    %42 = vector.broadcast %32 : vector<8x1xi32> to vector<8x128xi32>
    %43 = arith.cmpi eq, %27, %42 : vector<8x128xi32>
    %c-2147483648_i32_6 = arith.constant -2147483648 : i32
    %44 = vector.broadcast %c-2147483648_i32_6 : i32 to vector<8x128xi32>
    %45 = arith.select %43, %44, %27 : vector<8x128xi1>, vector<8x128xi32>
    %46 = arith.maxsi %41, %45 : vector<8x128xi32>
    %cst_7 = arith.constant dense<-2147483648> : vector<8xi32>
    %47 = vector.multi_reduction <maxsi>, %46, %cst_7 [1] : vector<8x128xi32> to vector<8xi32>
    %48 = vector.shape_cast %47 : vector<8xi32> to vector<8x1xi32>
    %c1_i32 = arith.constant 1 : i32
    %49 = vector.broadcast %c1_i32 : i32 to vector<8x16xi32>
    %50 = arith.cmpi eq, %28, %49 : vector<8x16xi32>
    %51 = vector.shape_cast %48 : vector<8x1xi32> to vector<8x1xi32>
    %52 = vector.broadcast %51 : vector<8x1xi32> to vector<8x16xi32>
    %53 = arith.select %50, %52, %37 : vector<8x16xi1>, vector<8x16xi32>
    %54 = vector.broadcast %48 : vector<8x1xi32> to vector<8x128xi32>
    %55 = arith.cmpi eq, %41, %54 : vector<8x128xi32>
    %c-2147483648_i32_8 = arith.constant -2147483648 : i32
    %56 = vector.broadcast %c-2147483648_i32_8 : i32 to vector<8x128xi32>
    %57 = arith.select %55, %56, %41 : vector<8x128xi1>, vector<8x128xi32>
    %58 = vector.broadcast %48 : vector<8x1xi32> to vector<8x128xi32>
    %59 = arith.cmpi eq, %45, %58 : vector<8x128xi32>
    %c-2147483648_i32_9 = arith.constant -2147483648 : i32
    %60 = vector.broadcast %c-2147483648_i32_9 : i32 to vector<8x128xi32>
    %61 = arith.select %59, %60, %45 : vector<8x128xi1>, vector<8x128xi32>
    %62 = arith.maxsi %57, %61 : vector<8x128xi32>
    %cst_10 = arith.constant dense<-2147483648> : vector<8xi32>
    %63 = vector.multi_reduction <maxsi>, %62, %cst_10 [1] : vector<8x128xi32> to vector<8xi32>
    %64 = vector.shape_cast %63 : vector<8xi32> to vector<8x1xi32>
    %c2_i32 = arith.constant 2 : i32
    %65 = vector.broadcast %c2_i32 : i32 to vector<8x16xi32>
    %66 = arith.cmpi eq, %28, %65 : vector<8x16xi32>
    %67 = vector.shape_cast %64 : vector<8x1xi32> to vector<8x1xi32>
    %68 = vector.broadcast %67 : vector<8x1xi32> to vector<8x16xi32>
    %69 = arith.select %66, %68, %53 : vector<8x16xi1>, vector<8x16xi32>
    %70 = vector.broadcast %64 : vector<8x1xi32> to vector<8x128xi32>
    %71 = arith.cmpi eq, %57, %70 : vector<8x128xi32>
    %c-2147483648_i32_11 = arith.constant -2147483648 : i32
    %72 = vector.broadcast %c-2147483648_i32_11 : i32 to vector<8x128xi32>
    %73 = arith.select %71, %72, %57 : vector<8x128xi1>, vector<8x128xi32>
    %74 = vector.broadcast %64 : vector<8x1xi32> to vector<8x128xi32>
    %75 = arith.cmpi eq, %61, %74 : vector<8x128xi32>
    %c-2147483648_i32_12 = arith.constant -2147483648 : i32
    %76 = vector.broadcast %c-2147483648_i32_12 : i32 to vector<8x128xi32>
    %77 = arith.select %75, %76, %61 : vector<8x128xi1>, vector<8x128xi32>
    %78 = arith.maxsi %73, %77 : vector<8x128xi32>
    %cst_13 = arith.constant dense<-2147483648> : vector<8xi32>
    %79 = vector.multi_reduction <maxsi>, %78, %cst_13 [1] : vector<8x128xi32> to vector<8xi32>
    %80 = vector.shape_cast %79 : vector<8xi32> to vector<8x1xi32>
    %c3_i32 = arith.constant 3 : i32
    %81 = vector.broadcast %c3_i32 : i32 to vector<8x16xi32>
    %82 = arith.cmpi eq, %28, %81 : vector<8x16xi32>
    %83 = vector.shape_cast %80 : vector<8x1xi32> to vector<8x1xi32>
    %84 = vector.broadcast %83 : vector<8x1xi32> to vector<8x16xi32>
    %85 = arith.select %82, %84, %69 : vector<8x16xi1>, vector<8x16xi32>
    %86 = vector.broadcast %80 : vector<8x1xi32> to vector<8x128xi32>
    %87 = arith.cmpi eq, %73, %86 : vector<8x128xi32>
    %c-2147483648_i32_14 = arith.constant -2147483648 : i32
    %88 = vector.broadcast %c-2147483648_i32_14 : i32 to vector<8x128xi32>
    %89 = arith.select %87, %88, %73 : vector<8x128xi1>, vector<8x128xi32>
    %90 = vector.broadcast %80 : vector<8x1xi32> to vector<8x128xi32>
    %91 = arith.cmpi eq, %77, %90 : vector<8x128xi32>
    %c-2147483648_i32_15 = arith.constant -2147483648 : i32
    %92 = vector.broadcast %c-2147483648_i32_15 : i32 to vector<8x128xi32>
    %93 = arith.select %91, %92, %77 : vector<8x128xi1>, vector<8x128xi32>
    %94 = arith.maxsi %89, %93 : vector<8x128xi32>
    %cst_16 = arith.constant dense<-2147483648> : vector<8xi32>
    %95 = vector.multi_reduction <maxsi>, %94, %cst_16 [1] : vector<8x128xi32> to vector<8xi32>
    %96 = vector.shape_cast %95 : vector<8xi32> to vector<8x1xi32>
    %c4_i32 = arith.constant 4 : i32
    %97 = vector.broadcast %c4_i32 : i32 to vector<8x16xi32>
    %98 = arith.cmpi eq, %28, %97 : vector<8x16xi32>
    %99 = vector.shape_cast %96 : vector<8x1xi32> to vector<8x1xi32>
    %100 = vector.broadcast %99 : vector<8x1xi32> to vector<8x16xi32>
    %101 = arith.select %98, %100, %85 : vector<8x16xi1>, vector<8x16xi32>
    %102 = vector.broadcast %96 : vector<8x1xi32> to vector<8x128xi32>
    %103 = arith.cmpi eq, %89, %102 : vector<8x128xi32>
    %c-2147483648_i32_17 = arith.constant -2147483648 : i32
    %104 = vector.broadcast %c-2147483648_i32_17 : i32 to vector<8x128xi32>
    %105 = arith.select %103, %104, %89 : vector<8x128xi1>, vector<8x128xi32>
    %106 = vector.broadcast %96 : vector<8x1xi32> to vector<8x128xi32>
    %107 = arith.cmpi eq, %93, %106 : vector<8x128xi32>
    %c-2147483648_i32_18 = arith.constant -2147483648 : i32
    %108 = vector.broadcast %c-2147483648_i32_18 : i32 to vector<8x128xi32>
    %109 = arith.select %107, %108, %93 : vector<8x128xi1>, vector<8x128xi32>
    %110 = arith.maxsi %105, %109 : vector<8x128xi32>
    %cst_19 = arith.constant dense<-2147483648> : vector<8xi32>
    %111 = vector.multi_reduction <maxsi>, %110, %cst_19 [1] : vector<8x128xi32> to vector<8xi32>
    %112 = vector.shape_cast %111 : vector<8xi32> to vector<8x1xi32>
    %c5_i32 = arith.constant 5 : i32
    %113 = vector.broadcast %c5_i32 : i32 to vector<8x16xi32>
    %114 = arith.cmpi eq, %28, %113 : vector<8x16xi32>
    %115 = vector.shape_cast %112 : vector<8x1xi32> to vector<8x1xi32>
    %116 = vector.broadcast %115 : vector<8x1xi32> to vector<8x16xi32>
    %117 = arith.select %114, %116, %101 : vector<8x16xi1>, vector<8x16xi32>
    %118 = vector.broadcast %112 : vector<8x1xi32> to vector<8x128xi32>
    %119 = arith.cmpi eq, %105, %118 : vector<8x128xi32>
    %c-2147483648_i32_20 = arith.constant -2147483648 : i32
    %120 = vector.broadcast %c-2147483648_i32_20 : i32 to vector<8x128xi32>
    %121 = arith.select %119, %120, %105 : vector<8x128xi1>, vector<8x128xi32>
    %122 = vector.broadcast %112 : vector<8x1xi32> to vector<8x128xi32>
    %123 = arith.cmpi eq, %109, %122 : vector<8x128xi32>
    %c-2147483648_i32_21 = arith.constant -2147483648 : i32
    %124 = vector.broadcast %c-2147483648_i32_21 : i32 to vector<8x128xi32>
    %125 = arith.select %123, %124, %109 : vector<8x128xi1>, vector<8x128xi32>
    %126 = arith.maxsi %121, %125 : vector<8x128xi32>
    %cst_22 = arith.constant dense<-2147483648> : vector<8xi32>
    %127 = vector.multi_reduction <maxsi>, %126, %cst_22 [1] : vector<8x128xi32> to vector<8xi32>
    %128 = vector.shape_cast %127 : vector<8xi32> to vector<8x1xi32>
    %c6_i32 = arith.constant 6 : i32
    %129 = vector.broadcast %c6_i32 : i32 to vector<8x16xi32>
    %130 = arith.cmpi eq, %28, %129 : vector<8x16xi32>
    %131 = vector.shape_cast %128 : vector<8x1xi32> to vector<8x1xi32>
    %132 = vector.broadcast %131 : vector<8x1xi32> to vector<8x16xi32>
    %133 = arith.select %130, %132, %117 : vector<8x16xi1>, vector<8x16xi32>
    %134 = vector.broadcast %128 : vector<8x1xi32> to vector<8x128xi32>
    %135 = arith.cmpi eq, %121, %134 : vector<8x128xi32>
    %c-2147483648_i32_23 = arith.constant -2147483648 : i32
    %136 = vector.broadcast %c-2147483648_i32_23 : i32 to vector<8x128xi32>
    %137 = arith.select %135, %136, %121 : vector<8x128xi1>, vector<8x128xi32>
    %138 = vector.broadcast %128 : vector<8x1xi32> to vector<8x128xi32>
    %139 = arith.cmpi eq, %125, %138 : vector<8x128xi32>
    %c-2147483648_i32_24 = arith.constant -2147483648 : i32
    %140 = vector.broadcast %c-2147483648_i32_24 : i32 to vector<8x128xi32>
    %141 = arith.select %139, %140, %125 : vector<8x128xi1>, vector<8x128xi32>
    %142 = arith.maxsi %137, %141 : vector<8x128xi32>
    %cst_25 = arith.constant dense<-2147483648> : vector<8xi32>
    %143 = vector.multi_reduction <maxsi>, %142, %cst_25 [1] : vector<8x128xi32> to vector<8xi32>
    %144 = vector.shape_cast %143 : vector<8xi32> to vector<8x1xi32>
    %c7_i32 = arith.constant 7 : i32
    %145 = vector.broadcast %c7_i32 : i32 to vector<8x16xi32>
    %146 = arith.cmpi eq, %28, %145 : vector<8x16xi32>
    %147 = vector.shape_cast %144 : vector<8x1xi32> to vector<8x1xi32>
    %148 = vector.broadcast %147 : vector<8x1xi32> to vector<8x16xi32>
    %149 = arith.select %146, %148, %133 : vector<8x16xi1>, vector<8x16xi32>
    %150 = vector.broadcast %144 : vector<8x1xi32> to vector<8x128xi32>
    %151 = arith.cmpi eq, %137, %150 : vector<8x128xi32>
    %c-2147483648_i32_26 = arith.constant -2147483648 : i32
    %152 = vector.broadcast %c-2147483648_i32_26 : i32 to vector<8x128xi32>
    %153 = arith.select %151, %152, %137 : vector<8x128xi1>, vector<8x128xi32>
    %154 = vector.broadcast %144 : vector<8x1xi32> to vector<8x128xi32>
    %155 = arith.cmpi eq, %141, %154 : vector<8x128xi32>
    %c-2147483648_i32_27 = arith.constant -2147483648 : i32
    %156 = vector.broadcast %c-2147483648_i32_27 : i32 to vector<8x128xi32>
    %157 = arith.select %155, %156, %141 : vector<8x128xi1>, vector<8x128xi32>
    %158 = arith.maxsi %153, %157 : vector<8x128xi32>
    %cst_28 = arith.constant dense<-2147483648> : vector<8xi32>
    %159 = vector.multi_reduction <maxsi>, %158, %cst_28 [1] : vector<8x128xi32> to vector<8xi32>
    %160 = vector.shape_cast %159 : vector<8xi32> to vector<8x1xi32>
    %c8_i32 = arith.constant 8 : i32
    %161 = vector.broadcast %c8_i32 : i32 to vector<8x16xi32>
    %162 = arith.cmpi eq, %28, %161 : vector<8x16xi32>
    %163 = vector.shape_cast %160 : vector<8x1xi32> to vector<8x1xi32>
    %164 = vector.broadcast %163 : vector<8x1xi32> to vector<8x16xi32>
    %165 = arith.select %162, %164, %149 : vector<8x16xi1>, vector<8x16xi32>
    %166 = vector.broadcast %160 : vector<8x1xi32> to vector<8x128xi32>
    %167 = arith.cmpi eq, %153, %166 : vector<8x128xi32>
    %c-2147483648_i32_29 = arith.constant -2147483648 : i32
    %168 = vector.broadcast %c-2147483648_i32_29 : i32 to vector<8x128xi32>
    %169 = arith.select %167, %168, %153 : vector<8x128xi1>, vector<8x128xi32>
    %170 = vector.broadcast %160 : vector<8x1xi32> to vector<8x128xi32>
    %171 = arith.cmpi eq, %157, %170 : vector<8x128xi32>
    %c-2147483648_i32_30 = arith.constant -2147483648 : i32
    %172 = vector.broadcast %c-2147483648_i32_30 : i32 to vector<8x128xi32>
    %173 = arith.select %171, %172, %157 : vector<8x128xi1>, vector<8x128xi32>
    %174 = arith.maxsi %169, %173 : vector<8x128xi32>
    %cst_31 = arith.constant dense<-2147483648> : vector<8xi32>
    %175 = vector.multi_reduction <maxsi>, %174, %cst_31 [1] : vector<8x128xi32> to vector<8xi32>
    %176 = vector.shape_cast %175 : vector<8xi32> to vector<8x1xi32>
    %c9_i32 = arith.constant 9 : i32
    %177 = vector.broadcast %c9_i32 : i32 to vector<8x16xi32>
    %178 = arith.cmpi eq, %28, %177 : vector<8x16xi32>
    %179 = vector.shape_cast %176 : vector<8x1xi32> to vector<8x1xi32>
    %180 = vector.broadcast %179 : vector<8x1xi32> to vector<8x16xi32>
    %181 = arith.select %178, %180, %165 : vector<8x16xi1>, vector<8x16xi32>
    %182 = vector.broadcast %176 : vector<8x1xi32> to vector<8x128xi32>
    %183 = arith.cmpi eq, %169, %182 : vector<8x128xi32>
    %c-2147483648_i32_32 = arith.constant -2147483648 : i32
    %184 = vector.broadcast %c-2147483648_i32_32 : i32 to vector<8x128xi32>
    %185 = arith.select %183, %184, %169 : vector<8x128xi1>, vector<8x128xi32>
    %186 = vector.broadcast %176 : vector<8x1xi32> to vector<8x128xi32>
    %187 = arith.cmpi eq, %173, %186 : vector<8x128xi32>
    %c-2147483648_i32_33 = arith.constant -2147483648 : i32
    %188 = vector.broadcast %c-2147483648_i32_33 : i32 to vector<8x128xi32>
    %189 = arith.select %187, %188, %173 : vector<8x128xi1>, vector<8x128xi32>
    %190 = arith.maxsi %185, %189 : vector<8x128xi32>
    %cst_34 = arith.constant dense<-2147483648> : vector<8xi32>
    %191 = vector.multi_reduction <maxsi>, %190, %cst_34 [1] : vector<8x128xi32> to vector<8xi32>
    %192 = vector.shape_cast %191 : vector<8xi32> to vector<8x1xi32>
    %c10_i32 = arith.constant 10 : i32
    %193 = vector.broadcast %c10_i32 : i32 to vector<8x16xi32>
    %194 = arith.cmpi eq, %28, %193 : vector<8x16xi32>
    %195 = vector.shape_cast %192 : vector<8x1xi32> to vector<8x1xi32>
    %196 = vector.broadcast %195 : vector<8x1xi32> to vector<8x16xi32>
    %197 = arith.select %194, %196, %181 : vector<8x16xi1>, vector<8x16xi32>
    %198 = vector.broadcast %192 : vector<8x1xi32> to vector<8x128xi32>
    %199 = arith.cmpi eq, %185, %198 : vector<8x128xi32>
    %c-2147483648_i32_35 = arith.constant -2147483648 : i32
    %200 = vector.broadcast %c-2147483648_i32_35 : i32 to vector<8x128xi32>
    %201 = arith.select %199, %200, %185 : vector<8x128xi1>, vector<8x128xi32>
    %202 = vector.broadcast %192 : vector<8x1xi32> to vector<8x128xi32>
    %203 = arith.cmpi eq, %189, %202 : vector<8x128xi32>
    %c-2147483648_i32_36 = arith.constant -2147483648 : i32
    %204 = vector.broadcast %c-2147483648_i32_36 : i32 to vector<8x128xi32>
    %205 = arith.select %203, %204, %189 : vector<8x128xi1>, vector<8x128xi32>
    %206 = arith.maxsi %201, %205 : vector<8x128xi32>
    %cst_37 = arith.constant dense<-2147483648> : vector<8xi32>
    %207 = vector.multi_reduction <maxsi>, %206, %cst_37 [1] : vector<8x128xi32> to vector<8xi32>
    %208 = vector.shape_cast %207 : vector<8xi32> to vector<8x1xi32>
    %c11_i32 = arith.constant 11 : i32
    %209 = vector.broadcast %c11_i32 : i32 to vector<8x16xi32>
    %210 = arith.cmpi eq, %28, %209 : vector<8x16xi32>
    %211 = vector.shape_cast %208 : vector<8x1xi32> to vector<8x1xi32>
    %212 = vector.broadcast %211 : vector<8x1xi32> to vector<8x16xi32>
    %213 = arith.select %210, %212, %197 : vector<8x16xi1>, vector<8x16xi32>
    %214 = vector.broadcast %208 : vector<8x1xi32> to vector<8x128xi32>
    %215 = arith.cmpi eq, %201, %214 : vector<8x128xi32>
    %c-2147483648_i32_38 = arith.constant -2147483648 : i32
    %216 = vector.broadcast %c-2147483648_i32_38 : i32 to vector<8x128xi32>
    %217 = arith.select %215, %216, %201 : vector<8x128xi1>, vector<8x128xi32>
    %218 = vector.broadcast %208 : vector<8x1xi32> to vector<8x128xi32>
    %219 = arith.cmpi eq, %205, %218 : vector<8x128xi32>
    %c-2147483648_i32_39 = arith.constant -2147483648 : i32
    %220 = vector.broadcast %c-2147483648_i32_39 : i32 to vector<8x128xi32>
    %221 = arith.select %219, %220, %205 : vector<8x128xi1>, vector<8x128xi32>
    %222 = arith.maxsi %217, %221 : vector<8x128xi32>
    %cst_40 = arith.constant dense<-2147483648> : vector<8xi32>
    %223 = vector.multi_reduction <maxsi>, %222, %cst_40 [1] : vector<8x128xi32> to vector<8xi32>
    %224 = vector.shape_cast %223 : vector<8xi32> to vector<8x1xi32>
    %c12_i32 = arith.constant 12 : i32
    %225 = vector.broadcast %c12_i32 : i32 to vector<8x16xi32>
    %226 = arith.cmpi eq, %28, %225 : vector<8x16xi32>
    %227 = vector.shape_cast %224 : vector<8x1xi32> to vector<8x1xi32>
    %228 = vector.broadcast %227 : vector<8x1xi32> to vector<8x16xi32>
    %229 = arith.select %226, %228, %213 : vector<8x16xi1>, vector<8x16xi32>
    %230 = vector.broadcast %224 : vector<8x1xi32> to vector<8x128xi32>
    %231 = arith.cmpi eq, %217, %230 : vector<8x128xi32>
    %c-2147483648_i32_41 = arith.constant -2147483648 : i32
    %232 = vector.broadcast %c-2147483648_i32_41 : i32 to vector<8x128xi32>
    %233 = arith.select %231, %232, %217 : vector<8x128xi1>, vector<8x128xi32>
    %234 = vector.broadcast %224 : vector<8x1xi32> to vector<8x128xi32>
    %235 = arith.cmpi eq, %221, %234 : vector<8x128xi32>
    %c-2147483648_i32_42 = arith.constant -2147483648 : i32
    %236 = vector.broadcast %c-2147483648_i32_42 : i32 to vector<8x128xi32>
    %237 = arith.select %235, %236, %221 : vector<8x128xi1>, vector<8x128xi32>
    %238 = arith.maxsi %233, %237 : vector<8x128xi32>
    %cst_43 = arith.constant dense<-2147483648> : vector<8xi32>
    %239 = vector.multi_reduction <maxsi>, %238, %cst_43 [1] : vector<8x128xi32> to vector<8xi32>
    %240 = vector.shape_cast %239 : vector<8xi32> to vector<8x1xi32>
    %c13_i32 = arith.constant 13 : i32
    %241 = vector.broadcast %c13_i32 : i32 to vector<8x16xi32>
    %242 = arith.cmpi eq, %28, %241 : vector<8x16xi32>
    %243 = vector.shape_cast %240 : vector<8x1xi32> to vector<8x1xi32>
    %244 = vector.broadcast %243 : vector<8x1xi32> to vector<8x16xi32>
    %245 = arith.select %242, %244, %229 : vector<8x16xi1>, vector<8x16xi32>
    %246 = vector.broadcast %240 : vector<8x1xi32> to vector<8x128xi32>
    %247 = arith.cmpi eq, %233, %246 : vector<8x128xi32>
    %c-2147483648_i32_44 = arith.constant -2147483648 : i32
    %248 = vector.broadcast %c-2147483648_i32_44 : i32 to vector<8x128xi32>
    %249 = arith.select %247, %248, %233 : vector<8x128xi1>, vector<8x128xi32>
    %250 = vector.broadcast %240 : vector<8x1xi32> to vector<8x128xi32>
    %251 = arith.cmpi eq, %237, %250 : vector<8x128xi32>
    %c-2147483648_i32_45 = arith.constant -2147483648 : i32
    %252 = vector.broadcast %c-2147483648_i32_45 : i32 to vector<8x128xi32>
    %253 = arith.select %251, %252, %237 : vector<8x128xi1>, vector<8x128xi32>
    %254 = arith.maxsi %249, %253 : vector<8x128xi32>
    %cst_46 = arith.constant dense<-2147483648> : vector<8xi32>
    %255 = vector.multi_reduction <maxsi>, %254, %cst_46 [1] : vector<8x128xi32> to vector<8xi32>
    %256 = vector.shape_cast %255 : vector<8xi32> to vector<8x1xi32>
    %c14_i32 = arith.constant 14 : i32
    %257 = vector.broadcast %c14_i32 : i32 to vector<8x16xi32>
    %258 = arith.cmpi eq, %28, %257 : vector<8x16xi32>
    %259 = vector.shape_cast %256 : vector<8x1xi32> to vector<8x1xi32>
    %260 = vector.broadcast %259 : vector<8x1xi32> to vector<8x16xi32>
    %261 = arith.select %258, %260, %245 : vector<8x16xi1>, vector<8x16xi32>
    %262 = vector.broadcast %256 : vector<8x1xi32> to vector<8x128xi32>
    %263 = arith.cmpi eq, %249, %262 : vector<8x128xi32>
    %c-2147483648_i32_47 = arith.constant -2147483648 : i32
    %264 = vector.broadcast %c-2147483648_i32_47 : i32 to vector<8x128xi32>
    %265 = arith.select %263, %264, %249 : vector<8x128xi1>, vector<8x128xi32>
    %266 = vector.broadcast %256 : vector<8x1xi32> to vector<8x128xi32>
    %267 = arith.cmpi eq, %253, %266 : vector<8x128xi32>
    %c-2147483648_i32_48 = arith.constant -2147483648 : i32
    %268 = vector.broadcast %c-2147483648_i32_48 : i32 to vector<8x128xi32>
    %269 = arith.select %267, %268, %253 : vector<8x128xi1>, vector<8x128xi32>
    %270 = arith.maxsi %265, %269 : vector<8x128xi32>
    %cst_49 = arith.constant dense<-2147483648> : vector<8xi32>
    %271 = vector.multi_reduction <maxsi>, %270, %cst_49 [1] : vector<8x128xi32> to vector<8xi32>
    %272 = vector.shape_cast %271 : vector<8xi32> to vector<8x1xi32>
    %c15_i32 = arith.constant 15 : i32
    %273 = vector.broadcast %c15_i32 : i32 to vector<8x16xi32>
    %274 = arith.cmpi eq, %28, %273 : vector<8x16xi32>
    %275 = vector.shape_cast %272 : vector<8x1xi32> to vector<8x1xi32>
    %276 = vector.broadcast %275 : vector<8x1xi32> to vector<8x16xi32>
    %277 = arith.select %274, %276, %261 : vector<8x16xi1>, vector<8x16xi32>
    %c65535_i32_50 = arith.constant 65535 : i32
    %278 = vector.broadcast %c65535_i32_50 : i32 to vector<8x16xi32>
    %279 = arith.andi %277, %278 : vector<8x16xi32>
    %c65535_i32_51 = arith.constant 65535 : i32
    %280 = vector.broadcast %c65535_i32_51 : i32 to vector<8x16xi32>
    %281 = arith.subi %280, %279 : vector<8x16xi32>
    %c16_i32_52 = arith.constant 16 : i32
    %282 = vector.broadcast %c16_i32_52 : i32 to vector<8x16xi32>
    %283 = arith.shrsi %277, %282 : vector<8x16xi32>
    %c0_i32_53 = arith.constant 0 : i32
    %284 = vector.broadcast %c0_i32_53 : i32 to vector<8x16xi32>
    %285 = arith.cmpi sge, %283, %284 : vector<8x16xi32>
    %c-32769_i32_54 = arith.constant -32769 : i32
    %286 = vector.broadcast %c-32769_i32_54 : i32 to vector<8x16xi32>
    %287 = arith.subi %286, %283 : vector<8x16xi32>
    %288 = arith.select %285, %283, %287 : vector<8x16xi1>, vector<8x16xi32>
    %c65536_i32_55 = arith.constant 65536 : i32
    %289 = vector.broadcast %c65536_i32_55 : i32 to vector<8x16xi32>
    %290 = arith.muli %288, %289 : vector<8x16xi32>
    %291 = tpu.bitcast %290 : vector<8x16xi32> -> vector<8x16xf32>
    %cst_56 = arith.constant 2.000000e-01 : f32
    %292 = vector.broadcast %cst_56 : f32 to vector<8x16xf32>
    %293 = arith.addf %291, %292 : vector<8x16xf32>
    %c-32640_i32_57 = arith.constant -32640 : i32
    %294 = vector.broadcast %c-32640_i32_57 : i32 to vector<8x16xi32>
    %295 = arith.cmpi eq, %283, %294 : vector<8x16xi32>
    %cst_58 = arith.constant -3.38953139E+38 : f32
    %296 = vector.broadcast %cst_58 : f32 to vector<8x16xf32>
    %297 = arith.select %295, %296, %293 : vector<8x16xi1>, vector<8x16xf32>
    %cst_59 = arith.constant 5.000000e-01 : f32
    %298 = vector.broadcast %cst_59 : f32 to vector<8x16xf32>
    %299 = arith.mulf %298, %297 : vector<8x16xf32>
    %300 = math.tanh %299 : vector<8x16xf32>
    %cst_60 = arith.constant 1.000000e+00 : f32
    %301 = vector.broadcast %cst_60 : f32 to vector<8x16xf32>
    %302 = arith.addf %300, %301 : vector<8x16xf32>
    %cst_61 = arith.constant 5.000000e-01 : f32
    %303 = vector.broadcast %cst_61 : f32 to vector<8x16xf32>
    %304 = arith.mulf %303, %302 : vector<8x16xf32>
    %cst_62 = arith.constant -3.38953139E+38 : f32
    %305 = vector.broadcast %cst_62 : f32 to vector<8x16xf32>
    %306 = arith.cmpf ogt, %297, %305 : vector<8x16xf32>
    %c0_63 = arith.constant 0 : index
    %c0_64 = arith.constant 0 : index
    %307 = vector.load %arg3[%c0_63, %c0_64] : memref<8x16xf32, #tpu.memory_space<vmem>>, vector<8x16xf32>
    %cst_65 = arith.constant 0.000000e+00 : f32
    %308 = vector.broadcast %cst_65 : f32 to vector<8x16xf32>
    %309 = arith.cmpf ogt, %307, %308 : vector<8x16xf32>
    %310 = arith.andi %306, %309 : vector<8x16xi1>
    %311 = arith.extui %310 : vector<8x16xi1> to vector<8x16xi32>
    %312 = arith.sitofp %311 : vector<8x16xi32> to vector<8x16xf32>
    %313 = arith.mulf %304, %312 : vector<8x16xf32>
    %314 = vector.shape_cast %313 : vector<8x16xf32> to vector<1x8x16xf32>
    %cst_66 = arith.constant dense<0.000000e+00> : vector<1xf32>
    %315 = vector.multi_reduction <add>, %314, %cst_66 [1, 2] : vector<1x8x16xf32> to vector<1xf32>
    %316 = vector.shape_cast %315 : vector<1xf32> to vector<1x1x1xf32>
    %317 = vector.extract %316[0, 0, 0] : f32 from vector<1x1x1xf32>
    %318 = vector.broadcast %317 : f32 to vector<1x1xf32>
    %319 = vector.shape_cast %312 : vector<8x16xf32> to vector<1x8x16xf32>
    %cst_67 = arith.constant dense<0.000000e+00> : vector<1xf32>
    %320 = vector.multi_reduction <add>, %319, %cst_67 [1, 2] : vector<1x8x16xf32> to vector<1xf32>
    %321 = vector.shape_cast %320 : vector<1xf32> to vector<1x1x1xf32>
    %322 = vector.extract %321[0, 0, 0] : f32 from vector<1x1x1xf32>
    %323 = vector.broadcast %322 : f32 to vector<1x1xf32>
    %324 = tpu.iota {dimensions = array<i32: 1>} : vector<1x128xi32>
    %c0_i32_68 = arith.constant 0 : i32
    %325 = vector.broadcast %c0_i32_68 : i32 to vector<1x128xi32>
    %326 = arith.cmpi eq, %324, %325 : vector<1x128xi32>
    %cst_69 = arith.constant 0.000000e+00 : f32
    %327 = vector.shape_cast %318 : vector<1x1xf32> to vector<1x1xf32>
    %328 = vector.broadcast %327 : vector<1x1xf32> to vector<1x128xf32>
    %329 = vector.broadcast %cst_69 : f32 to vector<1x128xf32>
    %330 = arith.select %326, %328, %329 : vector<1x128xi1>, vector<1x128xf32>
    %c1_i32_70 = arith.constant 1 : i32
    %331 = vector.broadcast %c1_i32_70 : i32 to vector<1x128xi32>
    %332 = arith.cmpi eq, %324, %331 : vector<1x128xi32>
    %cst_71 = arith.constant 0.000000e+00 : f32
    %333 = vector.shape_cast %323 : vector<1x1xf32> to vector<1x1xf32>
    %334 = vector.broadcast %333 : vector<1x1xf32> to vector<1x128xf32>
    %335 = vector.broadcast %cst_71 : f32 to vector<1x128xf32>
    %336 = arith.select %332, %334, %335 : vector<1x128xi1>, vector<1x128xf32>
    %337 = arith.addf %330, %336 : vector<1x128xf32>
    %338 = vector.shape_cast %337 : vector<1x128xf32> to vector<1x1x128xf32>
    %c0_72 = arith.constant 0 : index
    %c0_73 = arith.constant 0 : index
    %c0_74 = arith.constant 0 : index
    %339 = vector.load %arg5[%c0_72, %c0_73, %c0_74] : memref<1x1x128xf32, #tpu.memory_space<vmem>>, vector<1x1x128xf32>
    tpu.vector_store %arg5[%c0_72, %c0_73, %c0_74], %338 {strides = array<i32>} : memref<1x1x128xf32, #tpu.memory_space<vmem>>, vector<1x1x128xf32>,
    %340 = arith.sitofp %281 : vector<8x16xi32> to vector<8x16xf32>
    %cst_75 = arith.constant 0.000000e+00 : f32
    %341 = vector.broadcast %cst_75 : f32 to vector<8x64xf32>
    %342 = tpu.concatenate %297, %304, %340, %312, %341 in 1 : vector<8x16xf32>, vector<8x16xf32>, vector<8x16xf32>, vector<8x16xf32>, vector<8x64xf32> -> vector<8x128xf32>
    %c0_76 = arith.constant 0 : index
    %c0_77 = arith.constant 0 : index
    %343 = vector.load %arg4[%c0_76, %c0_77] : memref<8x128xf32, #tpu.memory_space<vmem>>, vector<8x128xf32>
    tpu.vector_store %arg4[%c0_76, %c0_77], %342 {strides = array<i32>} : memref<8x128xf32, #tpu.memory_space<vmem>>, vector<8x128xf32>,
    return
  }
  func.func @transform_0(%arg0: i32) -> (i32, i32) {
    %c0_i32 = arith.constant 0 : i32
    %c0_i32_0 = arith.constant 0 : i32
    return %arg0, %c0_i32 : i32, i32
  }
  func.func @transform_1(%arg0: i32) -> (i32, i32) {
    %c0_i32 = arith.constant 0 : i32
    %c0_i32_0 = arith.constant 0 : i32
    return %arg0, %c0_i32 : i32, i32
  }
  func.func @transform_2(%arg0: i32) -> (i32, i32) {
    %c0_i32 = arith.constant 0 : i32
    %c0_i32_0 = arith.constant 0 : i32
    return %arg0, %c0_i32 : i32, i32
  }
  func.func @transform_3(%arg0: i32) -> (i32, i32) {
    %c0_i32 = arith.constant 0 : i32
    %c0_i32_0 = arith.constant 0 : i32
    return %arg0, %c0_i32 : i32, i32
  }
  func.func @transform_4(%arg0: i32) -> (i32, i32, i32) {
    %c0_i32 = arith.constant 0 : i32
    %c0_i32_0 = arith.constant 0 : i32
    %c0_i32_1 = arith.constant 0 : i32
    return %arg0, %c0_i32, %c0_i32_0 : i32, i32, i32
  }
}

</mosaic_0001>

<bundles_post_ra>
// kernel: tpu_custom_call.1
= control target key start
LH: loop header
LB: loop body
LE: loop exit
PB: predicated region body
PF: predicated region fallthrough
CT: control target
= control target key end

     0   :  { %10 = vsyncpa [#allocation3], 0  ;;  %s769_s0 = inlined_call_operand.hbm [shape: bf16[8,256], index: 0, kind: input, shape index: {}]   ;;  %s770_s1 = inlined_call_operand.hbm [shape: s8[8,256], index: 1, kind: input, shape index: {}]   ;;  %s771_s2 = inlined_call_operand.hbm [shape: f32[8,16], index: 2, kind: input, shape index: {}]   ;;  %s772_s3 = inlined_call_operand.hbm [shape: f32[8,128], index: 3, kind: output, shape index: {0}]   ;;  %s773_s4 = inlined_call_operand.hbm [shape: f32[1,1,128], index: 4, kind: output, shape index: {1}]  }
   0x1   :  { %11 = vsyncpa [#allocation6], 0 }
   0x2   :  { %12 = vsyncpa [#allocation4], 0  ;;  %s30_s17 = sshll.u32 %s770_s1, 4  ;;  %s31_s17 = int_to_ptr.hbm [resolvable:$true] %s30_s17 }
   0x3   :  { %13 = vsyncpa [#allocation10], 0  ;;  %s688_s18 = smov [#allocation5]   ;;  %s19_s22 = sshll.u32 %s769_s0, 4  ;;  %s20_s22 = int_to_ptr.hbm [resolvable:$true] %s19_s22 }
   0x4   :  { %s32_s19 = sshll.u32 %s688_s18, 4  ;;  %s689_s23 = smov [#allocation2]   ;;  %s33_s19 = int_to_ptr.vmem [resolvable:$true] %s32_s19 }
   0x5   :  { %35 = dma.hbm_to_vmem [thread:$0]  %s31_s17, 64, %s33_s19, [#allocation6]  }
   0x6   :  { %s21_s24 = sshll.u32 %s689_s23, 4  ;;  %s41_s27 = sshll.u32 %s771_s2, 4  ;;  %s22_s24 = int_to_ptr.vmem [resolvable:$true] %s21_s24  ;;  %s42_s27 = int_to_ptr.hbm [resolvable:$true] %s41_s27 }
   0x7   :  { %24 = dma.hbm_to_vmem [thread:$0]  %s20_s22, 128, %s22_s24, [#allocation3]  }
   0x8   :  { %s690_s1 = smov [#allocation7]  }
   0x9   :  { %s43_s28 = sshll.u32 %s690_s1, 4  ;;  %s44_s28 = int_to_ptr.vmem [resolvable:$true] %s43_s28 }
   0xa   :  { %46 = dma.hbm_to_vmem [thread:$0]  %s42_s27, 128, %s44_s28, [#allocation6]  }
   0xb   :  { %680 = dma.done.wait [#allocation3], 128  }
   0xc   :  { %681 = vsyncadd [#allocation3], 4294967168 }
   0xd   :  { %682 = dma.done.wait [#allocation6], 192  }
   0xe   :  { %683 = vsyncadd [#allocation6], 4294967104  ;;  %v83_v0 = vlaneseq  ;;  %v61_v1 = vld [vmem:[#allocation2] sm:$0xff]  ;;  %v74_v2 = vld [vmem:[#allocation5] sm:$0xf]  ;;  %v691_v5 = vmov 0  }
   0xf   :  { %v62_v3 = vunpack.c.l.bf16 %v61_v1  ;;  %v63_v4 = vunpack.c.h.bf16 %v61_v1  ;;  %vm75_vm0 = vnez %v74_v2  ;;  %s693_s0 = smov 16   ;;  %s694_s2 = smov 48  }
  0x10   :  { %v76_v6 = vsel %vm75_vm0, 16843009, %v691_v5  ;;  %v732_v7 = vand.u32 127, %v83_v0  ;;  %s695_s29 = smov 32   ;;  %s696_s30 = smov [#allocation8]  }
  0x11   :  { %v66_v8 = vshra.s32 %v62_v3, 16  ;;  %v67_v9 = vshra.s32 %v63_v4, 16  ;;  %v77_v10 = vunpack.c.0.s8 %v76_v6  ;;  %v78_v11 = vunpack.c.1.s8 %v76_v6  ;;  %s514_s5 = sshll.u32 %s696_s30, 4  ;;  %s516_s8 = sshll.u32 %s772_s3, 4  ;;  %s515_s5 = int_to_ptr.vmem [resolvable:$true] %s514_s5  ;;  %s517_s8 = int_to_ptr.hbm [resolvable:$true] %s516_s8 }
  0x12   :  { %v86_v16 = vsub.s32 65535, %v732_v7  ;;  %v89_v17 = vsub.s32 65407, %v732_v7  ;;  %vm107_vm11 = vcmp.eq.s32.totalorder %v732_v7, 0  ;;  %vm129_vm12 = vcmp.eq.s32.totalorder %v732_v7, 1  ;;  %s697_s3 = smov [#allocation9]   ;;  %s527_s14 = sshll.u32 %s773_s4, 4  ;;  %s528_s14 = int_to_ptr.hbm [resolvable:$true] %s527_s14 }
  0x13   :  { %vm68_vm1 = vcmp.ge.s32.totalorder %v66_v8, 0  ;;  %vm69_vm2 = vcmp.ge.s32.totalorder %v67_v9, 0  ;;  %v70_v12 = vsub.s32 4294934527, %v66_v8  ;;  %v71_v13 = vsub.s32 4294934527, %v67_v9  ;;  %s525_s10 = sshll.u32 %s697_s3, 4  ;;  %s526_s10 = int_to_ptr.vmem [resolvable:$true] %s525_s10 }
  0x14   :  { %vm79_vm3 = vcmp.ne.s32.totalorder %v77_v10, 0  ;;  %vm80_vm4 = vcmp.ne.s32.totalorder %v78_v11, 0 }
  0x15   :  { %v72_v14 = vsel %vm68_vm1, %v66_v8, %v70_v12  ;;  %v73_v15 = vsel %vm69_vm2, %v67_v9, %v71_v13  ;;  %vm151_vm1 = vcmp.eq.s32.totalorder %v732_v7, 2 }
  0x16   :  { %v81_v18 = vsel %vm79_vm3, %v72_v14, 4294934656  ;;  %v82_v19 = vsel %vm80_vm4, %v73_v15, 4294934656 }
  0x17   :  { %v85_v20 = vmul.u32 65536, %v81_v18  ;;  %v88_v21 = vmul.u32 65536, %v82_v19 }
  0x19   :  { %v87_v22 = vadd.s32 %v86_v16, %v85_v20  ;;  %v90_v23 = vadd.s32 %v89_v17, %v88_v21 }
  0x1b   :  { %vm91_vm5 = vcmp.gt.s32.totalorder %v87_v22, %v90_v23 }
  0x1c   :  { %v92_v24 = vsel %vm91_vm5, %v87_v22, %v90_v23 }
  0x1d   :  { %v94_v25 = vshra.s32 %v92_v24, 16  ;;  %v93_v27 = vand.u32 65535, %v92_v24 }
  0x1f   :  { %v96_v26 = vcvt.s32.f32 %v94_v25  ;;  %v95_v28 = vcvt.s32.f32 %v93_v27 }
  0x21   :  { %97 = vmax.xlane.f32.xlu0 %v96_v26 }
  0x94   :  { %v98_v29 = vpop.xlane.xlu0 %97 }
  0x95   :  { %vm99_vm6 = vcmp.eq.f32.partialorder %v96_v26, %v98_v29  ;;  %v104_v31 = vcvt.f32.s32 %v98_v29 }
  0x96   :  { %v100_v30 = vsel %vm99_vm6, %v95_v28, -inf  ;;  %vm173_vm6 = vcmp.eq.s32.totalorder %v732_v7, 3 }
  0x97   :  { %101 = vmax.xlane.f32.xlu0 %v100_v30  ;;  %v105_v33 = vshll.u32 %v104_v31, 16 }
 0x10a   :  { %v102_v32 = vpop.xlane.xlu0 %101 }
 0x10b   :  { %v103_v34 = vcvt.f32.s32 %v102_v32 }
 0x10d   :  { %v106_v35 = vadd.s32 %v105_v33, %v103_v34 }
 0x10f   :  { %vm109_vm7 = vcmp.eq.s32.totalorder %v87_v22, %v106_v35  ;;  %vm111_vm8 = vcmp.eq.s32.totalorder %v90_v23, %v106_v35  ;;  %v108_v50 = vsel %vm107_vm11, %v106_v35, 0 }
 0x110   :  { %v110_v36 = vsel %vm109_vm7, 2147483648, %v87_v22  ;;  %v112_v37 = vsel %vm111_vm8, 2147483648, %v90_v23 }
 0x111   :  { %vm113_vm9 = vcmp.gt.s32.totalorder %v110_v36, %v112_v37 }
 0x112   :  { %v114_v38 = vsel %vm113_vm9, %v110_v36, %v112_v37 }
 0x113   :  { %v116_v39 = vshra.s32 %v114_v38, 16  ;;  %v115_v41 = vand.u32 65535, %v114_v38 }
 0x115   :  { %v118_v40 = vcvt.s32.f32 %v116_v39  ;;  %v117_v43 = vcvt.s32.f32 %v115_v41 }
 0x117   :  { %119 = vmax.xlane.f32.xlu1 %v118_v40 }
 0x18a   :  { %v120_v42 = vpop.xlane.xlu1 %119 }
 0x18b   :  { %vm121_vm10 = vcmp.eq.f32.partialorder %v118_v40, %v120_v42  ;;  %v126_v45 = vcvt.f32.s32 %v120_v42 }
 0x18c   :  { %v122_v44 = vsel %vm121_vm10, %v117_v43, -inf }
 0x18d   :  { %123 = vmax.xlane.f32.xlu1 %v122_v44  ;;  %v127_v47 = vshll.u32 %v126_v45, 16 }
 0x200   :  { %v124_v46 = vpop.xlane.xlu1 %123 }
 0x201   :  { %v125_v48 = vcvt.f32.s32 %v124_v46 }
 0x203   :  { %v128_v49 = vadd.s32 %v127_v47, %v125_v48 }
 0x205   :  { %v130_v51 = vsel %vm129_vm12, %v128_v49, %v108_v50  ;;  %vm131_vm13 = vcmp.eq.s32.totalorder %v110_v36, %v128_v49  ;;  %vm133_vm14 = vcmp.eq.s32.totalorder %v112_v37, %v128_v49 }
 0x206   :  { %v132_v52 = vsel %vm131_vm13, 2147483648, %v110_v36  ;;  %v134_v53 = vsel %vm133_vm14, 2147483648, %v112_v37  ;;  %vm195_vm13 = vcmp.eq.s32.totalorder %v732_v7, 4 }
 0x207   :  { %vm135_vm15 = vcmp.gt.s32.totalorder %v132_v52, %v134_v53 }
 0x208   :  { %v136_v54 = vsel %vm135_vm15, %v132_v52, %v134_v53 }
 0x209   :  { %v138_v55 = vshra.s32 %v136_v54, 16  ;;  %v137_v57 = vand.u32 65535, %v136_v54 }
 0x20b   :  { %v140_v56 = vcvt.s32.f32 %v138_v55  ;;  %v139_v59 = vcvt.s32.f32 %v137_v57 }
 0x20d   :  { %141 = vmax.xlane.f32.xlu2 %v140_v56 }
 0x280   :  { %v142_v58 = vpop.xlane.xlu2 %141 }
 0x281   :  { %vm143_vm0 = vcmp.eq.f32.partialorder %v140_v56, %v142_v58  ;;  %v148_v61 = vcvt.f32.s32 %v142_v58 }
 0x282   :  { %v144_v60 = vsel %vm143_vm0, %v139_v59, -inf }
 0x283   :  { %145 = vmax.xlane.f32.xlu2 %v144_v60  ;;  %v149_v63 = vshll.u32 %v148_v61, 16 }
 0x2f6   :  { %v146_v62 = vpop.xlane.xlu2 %145 }
 0x2f7   :  { %v147_v0 = vcvt.f32.s32 %v146_v62 }
 0x2f9   :  { %v150_v1 = vadd.s32 %v149_v63, %v147_v0 }
 0x2fb   :  { %v152_v2 = vsel %vm151_vm1, %v150_v1, %v130_v51  ;;  %vm153_vm2 = vcmp.eq.s32.totalorder %v132_v52, %v150_v1  ;;  %vm155_vm3 = vcmp.eq.s32.totalorder %v134_v53, %v150_v1 }
 0x2fc   :  { %v154_v3 = vsel %vm153_vm2, 2147483648, %v132_v52  ;;  %v156_v4 = vsel %vm155_vm3, 2147483648, %v134_v53  ;;  %vm217_vm2 = vcmp.eq.s32.totalorder %v732_v7, 5 }
 0x2fd   :  { %vm157_vm4 = vcmp.gt.s32.totalorder %v154_v3, %v156_v4 }
 0x2fe   :  { %v158_v5 = vsel %vm157_vm4, %v154_v3, %v156_v4 }
 0x2ff   :  { %v160_v6 = vshra.s32 %v158_v5, 16  ;;  %v159_v9 = vand.u32 65535, %v158_v5 }
 0x301   :  { %v162_v8 = vcvt.s32.f32 %v160_v6  ;;  %v161_v11 = vcvt.s32.f32 %v159_v9 }
 0x303   :  { %163 = vmax.xlane.f32.xlu0 %v162_v8 }
 0x376   :  { %v164_v10 = vpop.xlane.xlu0 %163 }
 0x377   :  { %vm165_vm5 = vcmp.eq.f32.partialorder %v162_v8, %v164_v10  ;;  %v170_v13 = vcvt.f32.s32 %v164_v10 }
 0x378   :  { %v166_v12 = vsel %vm165_vm5, %v161_v11, -inf }
 0x379   :  { %167 = vmax.xlane.f32.xlu1 %v166_v12  ;;  %v171_v15 = vshll.u32 %v170_v13, 16 }
 0x3ec   :  { %v168_v14 = vpop.xlane.xlu1 %167 }
 0x3ed   :  { %v169_v16 = vcvt.f32.s32 %v168_v14 }
 0x3ef   :  { %v172_v17 = vadd.s32 %v171_v15, %v169_v16 }
 0x3f1   :  { %v174_v18 = vsel %vm173_vm6, %v172_v17, %v152_v2  ;;  %vm175_vm7 = vcmp.eq.s32.totalorder %v154_v3, %v172_v17  ;;  %vm177_vm8 = vcmp.eq.s32.totalorder %v156_v4, %v172_v17 }
 0x3f2   :  { %v176_v19 = vsel %vm175_vm7, 2147483648, %v154_v3  ;;  %v178_v20 = vsel %vm177_vm8, 2147483648, %v156_v4  ;;  %vm239_vm7 = vcmp.eq.s32.totalorder %v732_v7, 6 }
 0x3f3   :  { %vm179_vm9 = vcmp.gt.s32.totalorder %v176_v19, %v178_v20 }
 0x3f4   :  { %v180_v21 = vsel %vm179_vm9, %v176_v19, %v178_v20 }
 0x3f5   :  { %v182_v22 = vshra.s32 %v180_v21, 16  ;;  %v181_v24 = vand.u32 65535, %v180_v21 }
 0x3f7   :  { %v184_v23 = vcvt.s32.f32 %v182_v22  ;;  %v183_v26 = vcvt.s32.f32 %v181_v24 }
 0x3f9   :  { %185 = vmax.xlane.f32.xlu2 %v184_v23 }
 0x46c   :  { %v186_v25 = vpop.xlane.xlu2 %185 }
 0x46d   :  { %vm187_vm10 = vcmp.eq.f32.partialorder %v184_v23, %v186_v25  ;;  %v192_v28 = vcvt.f32.s32 %v186_v25 }
 0x46e   :  { %v188_v27 = vsel %vm187_vm10, %v183_v26, -inf }
 0x46f   :  { %189 = vmax.xlane.f32.xlu0 %v188_v27  ;;  %v193_v30 = vshll.u32 %v192_v28, 16 }
 0x4e2   :  { %v190_v29 = vpop.xlane.xlu0 %189 }
 0x4e3   :  { %v191_v31 = vcvt.f32.s32 %v190_v29 }
 0x4e5   :  { %v194_v32 = vadd.s32 %v193_v30, %v191_v31 }
 0x4e7   :  { %v196_v33 = vsel %vm195_vm13, %v194_v32, %v174_v18  ;;  %vm197_vm14 = vcmp.eq.s32.totalorder %v176_v19, %v194_v32  ;;  %vm199_vm15 = vcmp.eq.s32.totalorder %v178_v20, %v194_v32 }
 0x4e8   :  { %v198_v34 = vsel %vm197_vm14, 2147483648, %v176_v19  ;;  %v200_v35 = vsel %vm199_vm15, 2147483648, %v178_v20  ;;  %vm261_vm14 = vcmp.eq.s32.totalorder %v732_v7, 7 }
 0x4e9   :  { %vm201_vm0 = vcmp.gt.s32.totalorder %v198_v34, %v200_v35 }
 0x4ea   :  { %v202_v36 = vsel %vm201_vm0, %v198_v34, %v200_v35 }
 0x4eb   :  { %v204_v37 = vshra.s32 %v202_v36, 16  ;;  %v203_v39 = vand.u32 65535, %v202_v36 }
 0x4ed   :  { %v206_v38 = vcvt.s32.f32 %v204_v37  ;;  %v205_v41 = vcvt.s32.f32 %v203_v39 }
 0x4ef   :  { %207 = vmax.xlane.f32.xlu1 %v206_v38 }
 0x562   :  { %v208_v40 = vpop.xlane.xlu1 %207 }
 0x563   :  { %vm209_vm1 = vcmp.eq.f32.partialorder %v206_v38, %v208_v40  ;;  %v214_v43 = vcvt.f32.s32 %v208_v40 }
 0x564   :  { %v210_v42 = vsel %vm209_vm1, %v205_v41, -inf }
 0x565   :  { %211 = vmax.xlane.f32.xlu2 %v210_v42  ;;  %v215_v45 = vshll.u32 %v214_v43, 16 }
 0x5d8   :  { %v212_v44 = vpop.xlane.xlu2 %211 }
 0x5d9   :  { %v213_v46 = vcvt.f32.s32 %v212_v44 }
 0x5db   :  { %v216_v47 = vadd.s32 %v215_v45, %v213_v46 }
 0x5dd   :  { %v218_v48 = vsel %vm217_vm2, %v216_v47, %v196_v33  ;;  %vm219_vm3 = vcmp.eq.s32.totalorder %v198_v34, %v216_v47  ;;  %vm221_vm4 = vcmp.eq.s32.totalorder %v200_v35, %v216_v47 }
 0x5de   :  { %v220_v49 = vsel %vm219_vm3, 2147483648, %v198_v34  ;;  %v222_v50 = vsel %vm221_vm4, 2147483648, %v200_v35  ;;  %vm283_vm3 = vcmp.eq.s32.totalorder %v732_v7, 8 }
 0x5df   :  { %vm223_vm5 = vcmp.gt.s32.totalorder %v220_v49, %v222_v50 }
 0x5e0   :  { %v224_v51 = vsel %vm223_vm5, %v220_v49, %v222_v50 }
 0x5e1   :  { %v226_v52 = vshra.s32 %v224_v51, 16  ;;  %v225_v54 = vand.u32 65535, %v224_v51 }
 0x5e3   :  { %v228_v53 = vcvt.s32.f32 %v226_v52  ;;  %v227_v56 = vcvt.s32.f32 %v225_v54 }
 0x5e5   :  { %229 = vmax.xlane.f32.xlu0 %v228_v53 }
 0x658   :  { %v230_v55 = vpop.xlane.xlu0 %229 }
 0x659   :  { %vm231_vm6 = vcmp.eq.f32.partialorder %v228_v53, %v230_v55  ;;  %v236_v58 = vcvt.f32.s32 %v230_v55 }
 0x65a   :  { %v232_v57 = vsel %vm231_vm6, %v227_v56, -inf }
 0x65b   :  { %233 = vmax.xlane.f32.xlu1 %v232_v57  ;;  %v237_v60 = vshll.u32 %v236_v58, 16 }
 0x6ce   :  { %v234_v59 = vpop.xlane.xlu1 %233 }
 0x6cf   :  { %v235_v61 = vcvt.f32.s32 %v234_v59 }
 0x6d1   :  { %v238_v62 = vadd.s32 %v237_v60, %v235_v61 }
 0x6d3   :  { %v240_v63 = vsel %vm239_vm7, %v238_v62, %v218_v48  ;;  %vm241_vm8 = vcmp.eq.s32.totalorder %v220_v49, %v238_v62  ;;  %vm243_vm9 = vcmp.eq.s32.totalorder %v222_v50, %v238_v62 }
 0x6d4   :  { %v242_v0 = vsel %vm241_vm8, 2147483648, %v220_v49  ;;  %v244_v1 = vsel %vm243_vm9, 2147483648, %v222_v50  ;;  %vm305_vm8 = vcmp.eq.s32.totalorder %v732_v7, 9 }
 0x6d5   :  { %vm245_vm10 = vcmp.gt.s32.totalorder %v242_v0, %v244_v1 }
 0x6d6   :  { %v246_v2 = vsel %vm245_vm10, %v242_v0, %v244_v1 }
 0x6d7   :  { %v248_v3 = vshra.s32 %v246_v2, 16  ;;  %v247_v5 = vand.u32 65535, %v246_v2 }
 0x6d9   :  { %v250_v4 = vcvt.s32.f32 %v248_v3  ;;  %v249_v8 = vcvt.s32.f32 %v247_v5 }
 0x6db   :  { %251 = vmax.xlane.f32.xlu2 %v250_v4 }
 0x74e   :  { %v252_v6 = vpop.xlane.xlu2 %251 }
 0x74f   :  { %vm253_vm13 = vcmp.eq.f32.partialorder %v250_v4, %v252_v6  ;;  %v258_v10 = vcvt.f32.s32 %v252_v6 }
 0x750   :  { %v254_v9 = vsel %vm253_vm13, %v249_v8, -inf }
 0x751   :  { %255 = vmax.xlane.f32.xlu0 %v254_v9  ;;  %v259_v12 = vshll.u32 %v258_v10, 16 }
 0x7c4   :  { %v256_v11 = vpop.xlane.xlu0 %255 }
 0x7c5   :  { %v257_v13 = vcvt.f32.s32 %v256_v11 }
 0x7c7   :  { %v260_v14 = vadd.s32 %v259_v12, %v257_v13 }
 0x7c9   :  { %v262_v15 = vsel %vm261_vm14, %v260_v14, %v240_v63  ;;  %vm263_vm15 = vcmp.eq.s32.totalorder %v242_v0, %v260_v14  ;;  %vm265_vm0 = vcmp.eq.s32.totalorder %v244_v1, %v260_v14 }
 0x7ca   :  { %v264_v16 = vsel %vm263_vm15, 2147483648, %v242_v0  ;;  %v266_v17 = vsel %vm265_vm0, 2147483648, %v244_v1  ;;  %vm327_vm15 = vcmp.eq.s32.totalorder %v732_v7, 10 }
 0x7cb   :  { %vm267_vm1 = vcmp.gt.s32.totalorder %v264_v16, %v266_v17 }
 0x7cc   :  { %v268_v18 = vsel %vm267_vm1, %v264_v16, %v266_v17 }
 0x7cd   :  { %v270_v19 = vshra.s32 %v268_v18, 16  ;;  %v269_v21 = vand.u32 65535, %v268_v18 }
 0x7cf   :  { %v272_v20 = vcvt.s32.f32 %v270_v19  ;;  %v271_v23 = vcvt.s32.f32 %v269_v21 }
 0x7d1   :  { %273 = vmax.xlane.f32.xlu1 %v272_v20 }
 0x844   :  { %v274_v22 = vpop.xlane.xlu1 %273 }
 0x845   :  { %vm275_vm2 = vcmp.eq.f32.partialorder %v272_v20, %v274_v22  ;;  %v280_v25 = vcvt.f32.s32 %v274_v22 }
 0x846   :  { %v276_v24 = vsel %vm275_vm2, %v271_v23, -inf }
 0x847   :  { %277 = vmax.xlane.f32.xlu2 %v276_v24  ;;  %v281_v27 = vshll.u32 %v280_v25, 16 }
 0x8ba   :  { %v278_v26 = vpop.xlane.xlu2 %277 }
 0x8bb   :  { %v279_v28 = vcvt.f32.s32 %v278_v26 }
 0x8bd   :  { %v282_v29 = vadd.s32 %v281_v27, %v279_v28 }
 0x8bf   :  { %v284_v30 = vsel %vm283_vm3, %v282_v29, %v262_v15  ;;  %vm285_vm4 = vcmp.eq.s32.totalorder %v264_v16, %v282_v29  ;;  %vm287_vm5 = vcmp.eq.s32.totalorder %v266_v17, %v282_v29 }
 0x8c0   :  { %v286_v31 = vsel %vm285_vm4, 2147483648, %v264_v16  ;;  %v288_v32 = vsel %vm287_vm5, 2147483648, %v266_v17  ;;  %vm349_vm4 = vcmp.eq.s32.totalorder %v732_v7, 11 }
 0x8c1   :  { %vm289_vm6 = vcmp.gt.s32.totalorder %v286_v31, %v288_v32 }
 0x8c2   :  { %v290_v33 = vsel %vm289_vm6, %v286_v31, %v288_v32 }
 0x8c3   :  { %v292_v34 = vshra.s32 %v290_v33, 16  ;;  %v291_v36 = vand.u32 65535, %v290_v33 }
 0x8c5   :  { %v294_v35 = vcvt.s32.f32 %v292_v34  ;;  %v293_v38 = vcvt.s32.f32 %v291_v36 }
 0x8c7   :  { %295 = vmax.xlane.f32.xlu0 %v294_v35 }
 0x93a   :  { %v296_v37 = vpop.xlane.xlu0 %295 }
 0x93b   :  { %vm297_vm7 = vcmp.eq.f32.partialorder %v294_v35, %v296_v37  ;;  %v302_v40 = vcvt.f32.s32 %v296_v37 }
 0x93c   :  { %v298_v39 = vsel %vm297_vm7, %v293_v38, -inf }
 0x93d   :  { %299 = vmax.xlane.f32.xlu1 %v298_v39  ;;  %v303_v42 = vshll.u32 %v302_v40, 16 }
 0x9b0   :  { %v300_v41 = vpop.xlane.xlu1 %299 }
 0x9b1   :  { %v301_v43 = vcvt.f32.s32 %v300_v41 }
 0x9b3   :  { %v304_v44 = vadd.s32 %v303_v42, %v301_v43 }
 0x9b5   :  { %v306_v45 = vsel %vm305_vm8, %v304_v44, %v284_v30  ;;  %vm307_vm9 = vcmp.eq.s32.totalorder %v286_v31, %v304_v44  ;;  %vm309_vm10 = vcmp.eq.s32.totalorder %v288_v32, %v304_v44 }
 0x9b6   :  { %v308_v46 = vsel %vm307_vm9, 2147483648, %v286_v31  ;;  %v310_v47 = vsel %vm309_vm10, 2147483648, %v288_v32  ;;  %vm371_vm9 = vcmp.eq.s32.totalorder %v732_v7, 12 }
 0x9b7   :  { %vm311_vm13 = vcmp.gt.s32.totalorder %v308_v46, %v310_v47 }
 0x9b8   :  { %v312_v48 = vsel %vm311_vm13, %v308_v46, %v310_v47 }
 0x9b9   :  { %v314_v49 = vshra.s32 %v312_v48, 16  ;;  %v313_v51 = vand.u32 65535, %v312_v48 }
 0x9bb   :  { %v316_v50 = vcvt.s32.f32 %v314_v49  ;;  %v315_v53 = vcvt.s32.f32 %v313_v51 }
 0x9bd   :  { %317 = vmax.xlane.f32.xlu2 %v316_v50 }
 0xa30   :  { %v318_v52 = vpop.xlane.xlu2 %317 }
 0xa31   :  { %vm319_vm14 = vcmp.eq.f32.partialorder %v316_v50, %v318_v52  ;;  %v324_v55 = vcvt.f32.s32 %v318_v52 }
 0xa32   :  { %v320_v54 = vsel %vm319_vm14, %v315_v53, -inf }
 0xa33   :  { %321 = vmax.xlane.f32.xlu0 %v320_v54  ;;  %v325_v57 = vshll.u32 %v324_v55, 16 }
 0xaa6   :  { %v322_v56 = vpop.xlane.xlu0 %321 }
 0xaa7   :  { %v323_v58 = vcvt.f32.s32 %v322_v56 }
 0xaa9   :  { %v326_v59 = vadd.s32 %v325_v57, %v323_v58 }
 0xaab   :  { %v328_v60 = vsel %vm327_vm15, %v326_v59, %v306_v45  ;;  %vm329_vm0 = vcmp.eq.s32.totalorder %v308_v46, %v326_v59  ;;  %vm331_vm1 = vcmp.eq.s32.totalorder %v310_v47, %v326_v59 }
 0xaac   :  { %v330_v61 = vsel %vm329_vm0, 2147483648, %v308_v46  ;;  %v332_v62 = vsel %vm331_vm1, 2147483648, %v310_v47  ;;  %vm393_vm0 = vcmp.eq.s32.totalorder %v732_v7, 13 }
 0xaad   :  { %vm333_vm2 = vcmp.gt.s32.totalorder %v330_v61, %v332_v62 }
 0xaae   :  { %v334_v63 = vsel %vm333_vm2, %v330_v61, %v332_v62 }
 0xaaf   :  { %v336_v0 = vshra.s32 %v334_v63, 16  ;;  %v335_v2 = vand.u32 65535, %v334_v63 }
 0xab1   :  { %v338_v1 = vcvt.s32.f32 %v336_v0  ;;  %v337_v4 = vcvt.s32.f32 %v335_v2 }
 0xab3   :  { %339 = vmax.xlane.f32.xlu1 %v338_v1 }
 0xb26   :  { %v340_v3 = vpop.xlane.xlu1 %339 }
 0xb27   :  { %vm341_vm3 = vcmp.eq.f32.partialorder %v338_v1, %v340_v3  ;;  %v346_v6 = vcvt.f32.s32 %v340_v3 }
 0xb28   :  { %v342_v5 = vsel %vm341_vm3, %v337_v4, -inf }
 0xb29   :  { %343 = vmax.xlane.f32.xlu2 %v342_v5  ;;  %v347_v9 = vshll.u32 %v346_v6, 16 }
 0xb9c   :  { %v344_v8 = vpop.xlane.xlu2 %343 }
 0xb9d   :  { %v345_v10 = vcvt.f32.s32 %v344_v8 }
 0xb9f   :  { %v348_v11 = vadd.s32 %v347_v9, %v345_v10 }
 0xba1   :  { %v350_v12 = vsel %vm349_vm4, %v348_v11, %v328_v60  ;;  %vm351_vm5 = vcmp.eq.s32.totalorder %v330_v61, %v348_v11  ;;  %vm353_vm6 = vcmp.eq.s32.totalorder %v332_v62, %v348_v11 }
 0xba2   :  { %v352_v13 = vsel %vm351_vm5, 2147483648, %v330_v61  ;;  %v354_v14 = vsel %vm353_vm6, 2147483648, %v332_v62  ;;  %vm415_vm5 = vcmp.eq.s32.totalorder %v732_v7, 14 }
 0xba3   :  { %vm355_vm7 = vcmp.gt.s32.totalorder %v352_v13, %v354_v14 }
 0xba4   :  { %v356_v15 = vsel %vm355_vm7, %v352_v13, %v354_v14 }
 0xba5   :  { %v358_v16 = vshra.s32 %v356_v15, 16  ;;  %v357_v18 = vand.u32 65535, %v356_v15 }
 0xba7   :  { %v360_v17 = vcvt.s32.f32 %v358_v16  ;;  %v359_v20 = vcvt.s32.f32 %v357_v18  ;;  %v692_v18 = vmov 0.0  }
 0xba9   :  { %361 = vmax.xlane.f32.xlu0 %v360_v17 }
 0xc1c   :  { %v362_v19 = vpop.xlane.xlu0 %361 }
 0xc1d   :  { %vm363_vm8 = vcmp.eq.f32.partialorder %v360_v17, %v362_v19  ;;  %v368_v22 = vcvt.f32.s32 %v362_v19 }
 0xc1e   :  { %v364_v21 = vsel %vm363_vm8, %v359_v20, -inf }
 0xc1f   :  { %365 = vmax.xlane.f32.xlu1 %v364_v21  ;;  %v369_v24 = vshll.u32 %v368_v22, 16 }
 0xc92   :  { %v366_v23 = vpop.xlane.xlu1 %365 }
 0xc93   :  { %v367_v25 = vcvt.f32.s32 %v366_v23 }
 0xc95   :  { %v370_v26 = vadd.s32 %v369_v24, %v367_v25 }
 0xc97   :  { %v372_v27 = vsel %vm371_vm9, %v370_v26, %v350_v12  ;;  %vm373_vm10 = vcmp.eq.s32.totalorder %v352_v13, %v370_v26  ;;  %vm375_vm13 = vcmp.eq.s32.totalorder %v354_v14, %v370_v26 }
 0xc98   :  { %v374_v28 = vsel %vm373_vm10, 2147483648, %v352_v13  ;;  %v376_v29 = vsel %vm375_vm13, 2147483648, %v354_v14  ;;  %vm437_vm10 = vcmp.eq.s32.totalorder %v732_v7, 15  ;;  %v455_v14 = vld [vmem:[#allocation7] sm:$0xff] }
 0xc99   :  { %vm377_vm14 = vcmp.gt.s32.totalorder %v374_v28, %v376_v29 }
 0xc9a   :  { %v378_v30 = vsel %vm377_vm14, %v374_v28, %v376_v29 }
 0xc9b   :  { %v380_v31 = vshra.s32 %v378_v30, 16  ;;  %v379_v33 = vand.u32 65535, %v378_v30 }
 0xc9d   :  { %v382_v32 = vcvt.s32.f32 %v380_v31  ;;  %v381_v35 = vcvt.s32.f32 %v379_v33 }
 0xc9f   :  { %383 = vmax.xlane.f32.xlu2 %v382_v32 }
 0xd12   :  { %v384_v34 = vpop.xlane.xlu2 %383 }
 0xd13   :  { %vm385_vm15 = vcmp.eq.f32.partialorder %v382_v32, %v384_v34  ;;  %v390_v37 = vcvt.f32.s32 %v384_v34 }
 0xd14   :  { %v386_v36 = vsel %vm385_vm15, %v381_v35, -inf  ;;  %vm456_vm15 = vcmp.gt.f32.partialorder %v455_v14, 0.0 }
 0xd15   :  { %387 = vmax.xlane.f32.xlu0 %v386_v36  ;;  %v391_v39 = vshll.u32 %v390_v37, 16 }
 0xd88   :  { %v388_v38 = vpop.xlane.xlu0 %387 }
 0xd89   :  { %v389_v40 = vcvt.f32.s32 %v388_v38 }
 0xd8b   :  { %v392_v41 = vadd.s32 %v391_v39, %v389_v40 }
 0xd8d   :  { %v394_v42 = vsel %vm393_vm0, %v392_v41, %v372_v27  ;;  %vm395_vm1 = vcmp.eq.s32.totalorder %v374_v28, %v392_v41  ;;  %vm397_vm2 = vcmp.eq.s32.totalorder %v376_v29, %v392_v41 }
 0xd8e   :  { %v396_v43 = vsel %vm395_vm1, 2147483648, %v374_v28  ;;  %v398_v44 = vsel %vm397_vm2, 2147483648, %v376_v29  ;;  %vm461_vm1 = vcmask 130048  }
 0xd8f   :  { %vm399_vm3 = vcmp.gt.s32.totalorder %v396_v43, %v398_v44 }
 0xd90   :  { %v400_v45 = vsel %vm399_vm3, %v396_v43, %v398_v44  ;;  %vm502_vm3 = vcmask 261120  }
 0xd91   :  { %v402_v46 = vshra.s32 %v400_v45, 16  ;;  %v401_v48 = vand.u32 65535, %v400_v45 }
 0xd93   :  { %v404_v47 = vcvt.s32.f32 %v402_v46  ;;  %v403_v50 = vcvt.s32.f32 %v401_v48 }
 0xd95   :  { %405 = vmax.xlane.f32.xlu1 %v404_v47 }
 0xe08   :  { %v406_v49 = vpop.xlane.xlu1 %405 }
 0xe09   :  { %vm407_vm4 = vcmp.eq.f32.partialorder %v404_v47, %v406_v49  ;;  %v412_v52 = vcvt.f32.s32 %v406_v49 }
 0xe0a   :  { %v408_v51 = vsel %vm407_vm4, %v403_v50, -inf  ;;  %vm504_vm4 = vcmask 392192  }
 0xe0b   :  { %409 = vmax.xlane.f32.xlu2 %v408_v51  ;;  %v413_v54 = vshll.u32 %v412_v52, 16 }
 0xe7e   :  { %v410_v53 = vpop.xlane.xlu2 %409 }
 0xe7f   :  { %v411_v55 = vcvt.f32.s32 %v410_v53 }
 0xe81   :  { %v414_v56 = vadd.s32 %v413_v54, %v411_v55 }
 0xe83   :  { %v416_v57 = vsel %vm415_vm5, %v414_v56, %v394_v42  ;;  %vm417_vm6 = vcmp.eq.s32.totalorder %v396_v43, %v414_v56  ;;  %vm419_vm7 = vcmp.eq.s32.totalorder %v398_v44, %v414_v56  ;;  %vm506_vm5 = vcmask 523264  }
 0xe84   :  { %v418_v58 = vsel %vm417_vm6, 2147483648, %v396_v43  ;;  %v420_v59 = vsel %vm419_vm7, 2147483648, %v398_v44 }
 0xe85   :  { %vm421_vm8 = vcmp.gt.s32.totalorder %v418_v58, %v420_v59 }
 0xe86   :  { %v422_v60 = vsel %vm421_vm8, %v418_v58, %v420_v59 }
 0xe87   :  { %v424_v61 = vshra.s32 %v422_v60, 16  ;;  %v423_v63 = vand.u32 65535, %v422_v60 }
 0xe89   :  { %v426_v62 = vcvt.s32.f32 %v424_v61  ;;  %v425_v1 = vcvt.s32.f32 %v423_v63 }
 0xe8b   :  { %427 = vmax.xlane.f32.xlu0 %v426_v62 }
 0xefe   :  { %v428_v0 = vpop.xlane.xlu0 %427 }
 0xeff   :  { %vm429_vm9 = vcmp.eq.f32.partialorder %v426_v62, %v428_v0  ;;  %v434_v3 = vcvt.f32.s32 %v428_v0 }
 0xf00   :  { %v430_v2 = vsel %vm429_vm9, %v425_v1, -inf }
 0xf01   :  { %431 = vmax.xlane.f32.xlu1 %v430_v2  ;;  %v435_v5 = vshll.u32 %v434_v3, 16 }
 0xf74   :  { %v432_v4 = vpop.xlane.xlu1 %431 }
 0xf75   :  { %v433_v6 = vcvt.f32.s32 %v432_v4 }
 0xf77   :  { %v436_v8 = vadd.s32 %v435_v5, %v433_v6 }
 0xf79   :  { %v438_v9 = vsel %vm437_vm10, %v436_v8, %v416_v57 }
 0xf7a   :  { %v441_v10 = vshra.s32 %v438_v9, 16  ;;  %v439_v26 = vand.u32 65535, %v438_v9 }
 0xf7c   :  { %vm442_vm13 = vcmp.ge.s32.totalorder %v441_v10, 0  ;;  %v443_v11 = vsub.s32 4294934527, %v441_v10  ;;  %vm448_vm14 = vcmp.eq.s32.totalorder %v441_v10, 4294934656  ;;  %v440_v27 = vsub.s32 65535, %v439_v26 }
 0xf7e   :  { %v444_v12 = vsel %vm442_vm13, %v441_v10, %v443_v11  ;;  %v488_v28 = vcvt.s32.f32 %v440_v27 }
 0xf7f   :  { %v445_v13 = vmul.u32 65536, %v444_v12 }
 0xf81   :  { %v447_v15 = vadd.f32 0.2, %v445_v13 }
 0xf83   :  { %v449_v16 = vsel %vm448_vm14, -3.3895314e+38, %v447_v15 }
 0xf84   :  { %vm454_vm0 = vcmp.gt.f32.partialorder %v449_v16, -3.3895314e+38  ;;  %v450_v17 = vmul.f32 0.5, %v449_v16 }
 0xf85   :  { %vm457_vm2 = vmand %vm454_vm0, %vm456_vm15 }
 0xf86   :  { %v543_v19 = vsel %vm457_vm2, 1.0, %v692_v18  ;;  %558 = vtanh.f32 %v450_v17 }
 0xf87   :  { %v472_v20 = vsel %vm461_vm1, %v543_v19, 0.0 }
 0xf88   :  { %473 = vadd.xlane.f32.xlu0 %v472_v20 }
 0xf8c   :  { %v559_v21 = vpop.eup %558 }
 0xf8d   :  { %v452_v22 = vadd.f32 1.0, %v559_v21 }
 0xf8f   :  { %v453_v23 = vmul.f32 0.5, %v452_v22 }
 0xf91   :  { %490 = vrot.lane.b32.xlu1 %v453_v23, %s693_s0  ;;  %v460_v24 = vmul.f32 %v543_v19, %v453_v23 }
 0xf93   :  { %v462_v25 = vsel %vm461_vm1, %v460_v24, 0.0 }
 0xf94   :  { %463 = vadd.xlane.f32.xlu2 %v462_v25 }
 0xf9c   :  { %498 = vrot.lane.b32.xlu0 %v543_v19, %s694_s2 }
 0xfac   :  { %494 = vrot.lane.b32.xlu2 %v488_v28, %s695_s29 }
 0xffb   :  { %v474_v29 = vpop.xlane.xlu0 %473 }
 0xffc   :  { %v475_v30 = vrot.slane %v474_v29, 4 }
 0xffe   :  { %v476_v31 = vadd.f32 %v475_v30, %v474_v29 }
0x1000   :  { %v477_v32 = vrot.slane %v476_v31, 2 }
0x1002   :  { %v478_v36 = vadd.f32 %v477_v32, %v476_v31 }
0x1003   :  { %v491_v37 = vpop.permute.xlu1 %490 }
0x1004   :  { %v501_v40 = vsel %vm461_vm1, %v449_v16, %v491_v37  ;;  %v479_v42 = vrot.slane %v478_v36, 1 }
0x1006   :  { %v480_v49 = vadd.f32 %v479_v42, %v478_v36 }
0x1007   :  { %v464_v33 = vpop.xlane.xlu2 %463 }
0x1008   :  { %v465_v34 = vrot.slane %v464_v33, 4 }
0x100a   :  { %v466_v35 = vadd.f32 %v465_v34, %v464_v33 }
0x100c   :  { %v467_v38 = vrot.slane %v466_v35, 2 }
0x100e   :  { %v468_v39 = vadd.f32 %v467_v38, %v466_v35  ;;  %v499_v43 = vpop.permute.xlu0 %498 }
0x100f   :  { %v495_v41 = vpop.permute.xlu2 %494 }
0x1010   :  { %v503_v44 = vsel %vm502_vm3, %v501_v40, %v495_v41  ;;  %v469_v45 = vrot.slane %v468_v39, 1 }
0x1011   :  { %v505_v46 = vsel %vm504_vm4, %v503_v44, %v499_v43 }
0x1012   :  { %v470_v47 = vadd.f32 %v469_v45, %v468_v39  ;;  %v507_v48 = vsel %vm506_vm5, %v505_v46, 0.0 }
0x1013   :  { %508 = vst [vmem:[#allocation8] sm:$0xff] %v507_v48 }
0x1014   :  { %544 = vpush %v470_v47  ;;  %519 = dma.vmem_to_hbm [thread:$0]  %s515_s5, 128, %s517_s8, [#allocation4]  }
0x1015   :  { %546 = vpush %v480_v49 }
0x1045   :  { %s545_s9 = spop %544 }
0x1046   :  { %v482_v50 = vstv %s545_s9  ;;  %s547_s11 = spop %546 }
0x1047   :  { %v483_v51 = vsel %vm107_vm11, %v482_v50, 0.0  ;;  %v484_v52 = vstv %s547_s11 }
0x1048   :  { %v485_v53 = vsel %vm129_vm12, %v484_v52, 0.0 }
0x1049   :  { %v486_v54 = vadd.f32 %v485_v53, %v483_v51 }
0x104b   :  { %487 = vst [vmem:[#allocation9] sm:$0x1] %v486_v54 }
0x104c   :  { %530 = dma.vmem_to_hbm [thread:$0]  %s526_s10, 16, %s528_s14, [#allocation10]  }
0x104d   :  { %684 = dma.done.wait [#allocation4], 128  }
0x104e   :  { %685 = vsyncadd [#allocation4], 4294967168 }
0x104f   :  { %686 = dma.done.wait [#allocation10], 16  }
0x1050   :  { %687 = vsyncadd [#allocation10], 4294967280 }
0x1051   :  { %539 = vsyncpa [#allocation3], 1 }
0x1052   :  { %540 = vsyncpa [#allocation6], 1 }
0x1053   :  { %541 = vsyncpa [#allocation4], 1 }
0x1054   :  { %542 = vsyncpa [#allocation10], 1 }

</bundles_post_ra>
